<compile_context>
chip_gen: v6e
topology: v6e:2x2x1
jax: 0.10.0
libtpu: 0.0.40
codegen_flags: <defaults>
</compile_context>

<pallas_src>
import functools

import jax
import jax.numpy as jnp
import numpy as np
from jax.experimental import pallas as pl
from jax.experimental.pallas import tpu as pltpu

LANES = 128
SUBLANES = 8


def _cdiv(a: int, b: int) -> int:
    return -(-a // b)


def _round_up(x: int, m: int) -> int:
    return _cdiv(x, m) * m


def mass_estimate_kernel(params_ref, states_ref, out_ref):
    """lcp_slack, batch-dense planes.

    params_ref : SMEM f32[36] = [f.weight (3x2) | f_bias (3) |
                                 G.weight (9x2) | G_bias (9)], row-major.
    states_ref : VMEM (5, S, 128)  planes = [x0, x1, lam0, lam1, lam2],
                 (sublane, lane) = batch.
    out_ref    : VMEM (3, S, 128)  planes = lcp_slack columns.
    """
    # Hoist all 36 SMEM scalar reads to the top (one sld each per grid step),
    # keeping scalar->vector broadcasts off the vector dependency chains.
    fw = [[params_ref[2 * i + j] for j in range(2)] for i in range(3)]
    fb = [params_ref[6 + i] for i in range(3)]
    gw = [[params_ref[9 + 2 * r + j] for j in range(2)] for r in range(9)]
    gb = [params_ref[27 + r] for r in range(9)]

    # Per-plane Ref indexing: dense (S, 128) tiles, fully packed 8x128 vregs.
    x0 = states_ref[0]
    x1 = states_ref[1]
    lam = (states_ref[2], states_ref[3], states_ref[4])

    # Pure VPU FMA ladder (K = 2): HBM-bound on v5e/v6e with this layout.
    # (v7x-only option: offload the 12-row linear part to the idle MXU.)
    for i in range(3):
        # fxu[:, i] = x0*fw[i,0] + x1*fw[i,1] + fb[i]
        acc = x0 * fw[i][0] + x1 * fw[i][1] + fb[i]
        # bmm row i: sum_j (x0*gw[r,0] + x1*gw[r,1] + gb[r]) * lam_j, r = 3*i+j
        for j in range(3):
            r = 3 * i + j
            g_ij = x0 * gw[r][0] + x1 * gw[r][1] + gb[r]
            acc = acc + g_ij * lam[j]
        out_ref[i] = acc  # dense, unmasked (S, 128) store


def _pack_params(f_weight, f_bias, g_weight, g_bias):
    return jnp.concatenate([
        jnp.asarray(f_weight, jnp.float32).reshape(-1),   # 6
        jnp.asarray(f_bias, jnp.float32).reshape(-1),     # 3
        jnp.asarray(g_weight, jnp.float32).reshape(-1),   # 18
        jnp.asarray(g_bias, jnp.float32).reshape(-1),     # 9
    ])                                                    # (36,)


def _block_sizing(n: int, block_sublanes: int):
    """Pick a sublane-aligned block size and padded extent for batch size n."""
    n_sub = _cdiv(n, LANES)                  # 128-lane rows needed
    n_sub8 = _round_up(n_sub, SUBLANES)      # sublane-align (dense 8x128 vregs)
    # Keep >= 2 grid steps when possible so v7x can shard the "parallel" batch
    # axis across its 2 TensorCores; cap at block_sublanes (MiB-scale tiles
    # sized so 2x double-buffered (5 in + 3 out) planes stay ~16 MiB).
    half = _round_up(_cdiv(n_sub8, 2), SUBLANES)
    s = min(block_sublanes, half)
    n_sub_pad = _round_up(n_sub8, s)
    return n_sub_pad, s


@functools.partial(jax.jit, static_argnames=("block_sublanes",))
def mass_estimate_forward_feature_major(states_fm, f_weight, f_bias, g_weight,
                                        g_bias, block_sublanes=2048):
    """Feature-major (SoA) entry point: states_fm is (5, N) float32 with rows
    [x0, x1, lam0, lam1, lam2].  Returns (3, N) lcp_slack.  Preferred contract:
    no HBM transpose passes at all."""
    states_fm = states_fm.astype(jnp.float32)
    feat, n = states_fm.shape
    assert feat == 5, "expects 5 feature rows: [x0, x1, lam0, lam1, lam2]"

    n_sub_pad, s = _block_sizing(n, block_sublanes)
    n_pad = n_sub_pad * LANES

    params = _pack_params(f_weight, f_bias, g_weight, g_bias)
    planes = jnp.pad(states_fm, ((0, 0), (0, n_pad - n)))
    planes = planes.reshape(5, n_sub_pad, LANES)

    out_planes = pl.pallas_call(
        mass_estimate_kernel,
        out_shape=jax.ShapeDtypeStruct((3, n_sub_pad, LANES), jnp.float32),
        grid_spec=pltpu.PrefetchScalarGridSpec(
            num_scalar_prefetch=1,
            grid=(n_sub_pad // s,),
            in_specs=[pl.BlockSpec((5, s, LANES), lambda i, params: (0, i, 0))],
            out_specs=pl.BlockSpec((3, s, LANES), lambda i, params: (0, i, 0)),
        ),
        compiler_params=pltpu.CompilerParams(
            dimension_semantics=("parallel",),
            vmem_limit_bytes=32 * 1024 * 1024,
        ),
        cost_estimate=pl.CostEstimate(
            flops=66 * n_pad,
            transcendentals=0,
            bytes_accessed=(5 + 3) * 4 * n_pad,
        ),
    )(params, planes)

    # Padded tail lanes hold junk (e.g. the +20 bias); slice before returning.
    return out_planes.reshape(3, n_pad)[:, :n]


@functools.partial(jax.jit, static_argnames=("block_sublanes",))
def mass_estimate_forward(states, f_weight, f_bias, g_weight, g_bias,
                          block_sublanes=2048):
    """Same contract as MassEstimateNet.forward: (N, F>=5) -> (N, 3).
    The slice/transpose/pad are fused under this jit; for best end-to-end
    bandwidth prefer the feature-major entry point above."""
    states = jnp.asarray(states, jnp.float32)
    assert states.shape[1] >= 5, "expects xus = [:, 0:2], lambdas = [:, 2:5]"
    out_fm = mass_estimate_forward_feature_major(
        states[:, :5].T, f_weight, f_bias, g_weight, g_bias,
        block_sublanes=block_sublanes)
    return out_fm.T


def _reference(states, f_weight, f_bias, g_weight, g_bias):
    hi = jax.lax.Precision.HIGHEST
    xus = states[:, 0:2]
    lam = states[:, 2:5]
    fxu = jnp.einsum("nk,ok->no", xus, f_weight, precision=hi) + f_bias
    gxu = (jnp.einsum("nk,ok->no", xus, g_weight, precision=hi) + g_bias)
    gxu = gxu.reshape(-1, 3, 3)
    return fxu + jnp.einsum("nij,nj->ni", gxu, lam, precision=hi)


if __name__ == "__main__":
    # Deterministic parameters exactly as set in MassEstimateNet.__init__.
    f_weight = jnp.array([[1.0, 1.0], [-1.0, -1.0], [0.0, 0.0]], jnp.float32)  # (3, 2)
    f_bias = jnp.array([0.0, 0.0, 20.0], jnp.float32)                          # (3,)
    g_weight = jnp.zeros((9, 2), jnp.float32)                                  # (9, 2)
    g_bias = jnp.array([1, -1, 1, -1, 1, 1, -1, -1, 0], jnp.float32)           # (9,)

    # Small deterministic input: batch of 8 states, 5 features each.
    key = jax.random.PRNGKey(0)
    states = jax.random.normal(key, (8, 5), dtype=jnp.float32)

    out = jax.block_until_ready(
        mass_estimate_forward(states, f_weight, f_bias, g_weight, g_bias))
    ref = _reference(states, f_weight, f_bias, g_weight, g_bias)
    np.testing.assert_allclose(np.asarray(out), np.asarray(ref),
                               rtol=1e-5, atol=1e-5)

    # Non-trivial G/f weights + a larger, non-tile-multiple batch to exercise
    # padding, a multi-step grid and the feature-major entry point.
    k1, k2, k3 = jax.random.split(jax.random.PRNGKey(1), 3)
    fw2 = jax.random.normal(k1, (3, 2), dtype=jnp.float32)
    gw2 = jax.random.normal(k2, (9, 2), dtype=jnp.float32)
    states2 = jax.random.normal(k3, (3000, 5), dtype=jnp.float32)

    out2 = jax.block_until_ready(
        mass_estimate_forward(states2, fw2, f_bias, gw2, g_bias,
                              block_sublanes=8))        # force a 3-step grid
    ref2 = _reference(states2, fw2, f_bias, gw2, g_bias)
    np.testing.assert_allclose(np.asarray(out2), np.asarray(ref2),
                               rtol=1e-4, atol=1e-4)

    out_fm = jax.block_until_ready(
        mass_estimate_forward_feature_major(states2[:, :5].T, fw2, f_bias,
                                            gw2, g_bias))
    np.testing.assert_allclose(np.asarray(out_fm.T), np.asarray(ref2),
                               rtol=1e-4, atol=1e-4)

    print("KERNEL_OK")
</pallas_src>

<mosaic_0001>
module attributes {stable_mosaic.version = 11 : i64} {
  func.func @mass_estimate_kernel(%arg0: i32, %arg1: memref<36xf32, #tpu.memory_space<smem>>, %arg2: memref<5x8x128xf32, #tpu.memory_space<vmem>>, %arg3: memref<3x8x128xf32, #tpu.memory_space<vmem>>) attributes {dimension_semantics = [#tpu.dimension_semantics<parallel>], iteration_bounds = array<i64: 1>, scalar_prefetch = 1 : i64, scratch_operands = 0 : i64, tpu.core_type = #tpu.core_type<tc>, window_params = [{transform_indices = @transform_0, window_bounds = array<i64: 5, 8, 128>}, {transform_indices = @transform_1, window_bounds = array<i64: 3, 8, 128>}]} {
    %c0 = arith.constant 0 : index
    %0 = memref.load %arg1[%c0] : memref<36xf32, #tpu.memory_space<smem>>
    %c1 = arith.constant 1 : index
    %1 = memref.load %arg1[%c1] : memref<36xf32, #tpu.memory_space<smem>>
    %c2 = arith.constant 2 : index
    %2 = memref.load %arg1[%c2] : memref<36xf32, #tpu.memory_space<smem>>
    %c3 = arith.constant 3 : index
    %3 = memref.load %arg1[%c3] : memref<36xf32, #tpu.memory_space<smem>>
    %c4 = arith.constant 4 : index
    %4 = memref.load %arg1[%c4] : memref<36xf32, #tpu.memory_space<smem>>
    %c5 = arith.constant 5 : index
    %5 = memref.load %arg1[%c5] : memref<36xf32, #tpu.memory_space<smem>>
    %c6 = arith.constant 6 : index
    %6 = memref.load %arg1[%c6] : memref<36xf32, #tpu.memory_space<smem>>
    %c7 = arith.constant 7 : index
    %7 = memref.load %arg1[%c7] : memref<36xf32, #tpu.memory_space<smem>>
    %c8 = arith.constant 8 : index
    %8 = memref.load %arg1[%c8] : memref<36xf32, #tpu.memory_space<smem>>
    %c9 = arith.constant 9 : index
    %9 = memref.load %arg1[%c9] : memref<36xf32, #tpu.memory_space<smem>>
    %c10 = arith.constant 10 : index
    %10 = memref.load %arg1[%c10] : memref<36xf32, #tpu.memory_space<smem>>
    %c11 = arith.constant 11 : index
    %11 = memref.load %arg1[%c11] : memref<36xf32, #tpu.memory_space<smem>>
    %c12 = arith.constant 12 : index
    %12 = memref.load %arg1[%c12] : memref<36xf32, #tpu.memory_space<smem>>
    %c13 = arith.constant 13 : index
    %13 = memref.load %arg1[%c13] : memref<36xf32, #tpu.memory_space<smem>>
    %c14 = arith.constant 14 : index
    %14 = memref.load %arg1[%c14] : memref<36xf32, #tpu.memory_space<smem>>
    %c15 = arith.constant 15 : index
    %15 = memref.load %arg1[%c15] : memref<36xf32, #tpu.memory_space<smem>>
    %c16 = arith.constant 16 : index
    %16 = memref.load %arg1[%c16] : memref<36xf32, #tpu.memory_space<smem>>
    %c17 = arith.constant 17 : index
    %17 = memref.load %arg1[%c17] : memref<36xf32, #tpu.memory_space<smem>>
    %c18 = arith.constant 18 : index
    %18 = memref.load %arg1[%c18] : memref<36xf32, #tpu.memory_space<smem>>
    %c19 = arith.constant 19 : index
    %19 = memref.load %arg1[%c19] : memref<36xf32, #tpu.memory_space<smem>>
    %c20 = arith.constant 20 : index
    %20 = memref.load %arg1[%c20] : memref<36xf32, #tpu.memory_space<smem>>
    %c21 = arith.constant 21 : index
    %21 = memref.load %arg1[%c21] : memref<36xf32, #tpu.memory_space<smem>>
    %c22 = arith.constant 22 : index
    %22 = memref.load %arg1[%c22] : memref<36xf32, #tpu.memory_space<smem>>
    %c23 = arith.constant 23 : index
    %23 = memref.load %arg1[%c23] : memref<36xf32, #tpu.memory_space<smem>>
    %c24 = arith.constant 24 : index
    %24 = memref.load %arg1[%c24] : memref<36xf32, #tpu.memory_space<smem>>
    %c25 = arith.constant 25 : index
    %25 = memref.load %arg1[%c25] : memref<36xf32, #tpu.memory_space<smem>>
    %c26 = arith.constant 26 : index
    %26 = memref.load %arg1[%c26] : memref<36xf32, #tpu.memory_space<smem>>
    %c27 = arith.constant 27 : index
    %27 = memref.load %arg1[%c27] : memref<36xf32, #tpu.memory_space<smem>>
    %c28 = arith.constant 28 : index
    %28 = memref.load %arg1[%c28] : memref<36xf32, #tpu.memory_space<smem>>
    %c29 = arith.constant 29 : index
    %29 = memref.load %arg1[%c29] : memref<36xf32, #tpu.memory_space<smem>>
    %c30 = arith.constant 30 : index
    %30 = memref.load %arg1[%c30] : memref<36xf32, #tpu.memory_space<smem>>
    %c31 = arith.constant 31 : index
    %31 = memref.load %arg1[%c31] : memref<36xf32, #tpu.memory_space<smem>>
    %c32 = arith.constant 32 : index
    %32 = memref.load %arg1[%c32] : memref<36xf32, #tpu.memory_space<smem>>
    %c33 = arith.constant 33 : index
    %33 = memref.load %arg1[%c33] : memref<36xf32, #tpu.memory_space<smem>>
    %c34 = arith.constant 34 : index
    %34 = memref.load %arg1[%c34] : memref<36xf32, #tpu.memory_space<smem>>
    %c35 = arith.constant 35 : index
    %35 = memref.load %arg1[%c35] : memref<36xf32, #tpu.memory_space<smem>>
    %c0_0 = arith.constant 0 : index
    %c0_1 = arith.constant 0 : index
    %c0_2 = arith.constant 0 : index
    %36 = vector.load %arg2[%c0_0, %c0_1, %c0_2] : memref<5x8x128xf32, #tpu.memory_space<vmem>>, vector<1x8x128xf32>
    %37 = vector.shape_cast %36 : vector<1x8x128xf32> to vector<8x128xf32>
    %c1_3 = arith.constant 1 : index
    %c0_4 = arith.constant 0 : index
    %c0_5 = arith.constant 0 : index
    %38 = vector.load %arg2[%c1_3, %c0_4, %c0_5] : memref<5x8x128xf32, #tpu.memory_space<vmem>>, vector<1x8x128xf32>
    %39 = vector.shape_cast %38 : vector<1x8x128xf32> to vector<8x128xf32>
    %c2_6 = arith.constant 2 : index
    %c0_7 = arith.constant 0 : index
    %c0_8 = arith.constant 0 : index
    %40 = vector.load %arg2[%c2_6, %c0_7, %c0_8] : memref<5x8x128xf32, #tpu.memory_space<vmem>>, vector<1x8x128xf32>
    %41 = vector.shape_cast %40 : vector<1x8x128xf32> to vector<8x128xf32>
    %c3_9 = arith.constant 3 : index
    %c0_10 = arith.constant 0 : index
    %c0_11 = arith.constant 0 : index
    %42 = vector.load %arg2[%c3_9, %c0_10, %c0_11] : memref<5x8x128xf32, #tpu.memory_space<vmem>>, vector<1x8x128xf32>
    %43 = vector.shape_cast %42 : vector<1x8x128xf32> to vector<8x128xf32>
    %c4_12 = arith.constant 4 : index
    %c0_13 = arith.constant 0 : index
    %c0_14 = arith.constant 0 : index
    %44 = vector.load %arg2[%c4_12, %c0_13, %c0_14] : memref<5x8x128xf32, #tpu.memory_space<vmem>>, vector<1x8x128xf32>
    %45 = vector.shape_cast %44 : vector<1x8x128xf32> to vector<8x128xf32>
    %46 = vector.broadcast %0 : f32 to vector<8x128xf32>
    %47 = arith.mulf %37, %46 : vector<8x128xf32>
    %48 = vector.broadcast %1 : f32 to vector<8x128xf32>
    %49 = arith.mulf %39, %48 : vector<8x128xf32>
    %50 = arith.addf %47, %49 : vector<8x128xf32>
    %51 = vector.broadcast %6 : f32 to vector<8x128xf32>
    %52 = arith.addf %50, %51 : vector<8x128xf32>
    %53 = vector.broadcast %9 : f32 to vector<8x128xf32>
    %54 = arith.mulf %37, %53 : vector<8x128xf32>
    %55 = vector.broadcast %10 : f32 to vector<8x128xf32>
    %56 = arith.mulf %39, %55 : vector<8x128xf32>
    %57 = arith.addf %54, %56 : vector<8x128xf32>
    %58 = vector.broadcast %27 : f32 to vector<8x128xf32>
    %59 = arith.addf %57, %58 : vector<8x128xf32>
    %60 = arith.mulf %59, %41 : vector<8x128xf32>
    %61 = arith.addf %52, %60 : vector<8x128xf32>
    %62 = vector.broadcast %11 : f32 to vector<8x128xf32>
    %63 = arith.mulf %37, %62 : vector<8x128xf32>
    %64 = vector.broadcast %12 : f32 to vector<8x128xf32>
    %65 = arith.mulf %39, %64 : vector<8x128xf32>
    %66 = arith.addf %63, %65 : vector<8x128xf32>
    %67 = vector.broadcast %28 : f32 to vector<8x128xf32>
    %68 = arith.addf %66, %67 : vector<8x128xf32>
    %69 = arith.mulf %68, %43 : vector<8x128xf32>
    %70 = arith.addf %61, %69 : vector<8x128xf32>
    %71 = vector.broadcast %13 : f32 to vector<8x128xf32>
    %72 = arith.mulf %37, %71 : vector<8x128xf32>
    %73 = vector.broadcast %14 : f32 to vector<8x128xf32>
    %74 = arith.mulf %39, %73 : vector<8x128xf32>
    %75 = arith.addf %72, %74 : vector<8x128xf32>
    %76 = vector.broadcast %29 : f32 to vector<8x128xf32>
    %77 = arith.addf %75, %76 : vector<8x128xf32>
    %78 = arith.mulf %77, %45 : vector<8x128xf32>
    %79 = arith.addf %70, %78 : vector<8x128xf32>
    %c0_15 = arith.constant 0 : index
    %c0_16 = arith.constant 0 : index
    %c0_17 = arith.constant 0 : index
    %80 = vector.load %arg3[%c0_15, %c0_16, %c0_17] : memref<3x8x128xf32, #tpu.memory_space<vmem>>, vector<1x8x128xf32>
    %81 = vector.shape_cast %80 : vector<1x8x128xf32> to vector<8x128xf32>
    %82 = vector.shape_cast %79 : vector<8x128xf32> to vector<1x8x128xf32>
    tpu.vector_store %arg3[%c0_15, %c0_16, %c0_17], %82 {strides = array<i32>} : memref<3x8x128xf32, #tpu.memory_space<vmem>>, vector<1x8x128xf32>,
    %83 = vector.broadcast %2 : f32 to vector<8x128xf32>
    %84 = arith.mulf %37, %83 : vector<8x128xf32>
    %85 = vector.broadcast %3 : f32 to vector<8x128xf32>
    %86 = arith.mulf %39, %85 : vector<8x128xf32>
    %87 = arith.addf %84, %86 : vector<8x128xf32>
    %88 = vector.broadcast %7 : f32 to vector<8x128xf32>
    %89 = arith.addf %87, %88 : vector<8x128xf32>
    %90 = vector.broadcast %15 : f32 to vector<8x128xf32>
    %91 = arith.mulf %37, %90 : vector<8x128xf32>
    %92 = vector.broadcast %16 : f32 to vector<8x128xf32>
    %93 = arith.mulf %39, %92 : vector<8x128xf32>
    %94 = arith.addf %91, %93 : vector<8x128xf32>
    %95 = vector.broadcast %30 : f32 to vector<8x128xf32>
    %96 = arith.addf %94, %95 : vector<8x128xf32>
    %97 = arith.mulf %96, %41 : vector<8x128xf32>
    %98 = arith.addf %89, %97 : vector<8x128xf32>
    %99 = vector.broadcast %17 : f32 to vector<8x128xf32>
    %100 = arith.mulf %37, %99 : vector<8x128xf32>
    %101 = vector.broadcast %18 : f32 to vector<8x128xf32>
    %102 = arith.mulf %39, %101 : vector<8x128xf32>
    %103 = arith.addf %100, %102 : vector<8x128xf32>
    %104 = vector.broadcast %31 : f32 to vector<8x128xf32>
    %105 = arith.addf %103, %104 : vector<8x128xf32>
    %106 = arith.mulf %105, %43 : vector<8x128xf32>
    %107 = arith.addf %98, %106 : vector<8x128xf32>
    %108 = vector.broadcast %19 : f32 to vector<8x128xf32>
    %109 = arith.mulf %37, %108 : vector<8x128xf32>
    %110 = vector.broadcast %20 : f32 to vector<8x128xf32>
    %111 = arith.mulf %39, %110 : vector<8x128xf32>
    %112 = arith.addf %109, %111 : vector<8x128xf32>
    %113 = vector.broadcast %32 : f32 to vector<8x128xf32>
    %114 = arith.addf %112, %113 : vector<8x128xf32>
    %115 = arith.mulf %114, %45 : vector<8x128xf32>
    %116 = arith.addf %107, %115 : vector<8x128xf32>
    %c1_18 = arith.constant 1 : index
    %c0_19 = arith.constant 0 : index
    %c0_20 = arith.constant 0 : index
    %117 = vector.load %arg3[%c1_18, %c0_19, %c0_20] : memref<3x8x128xf32, #tpu.memory_space<vmem>>, vector<1x8x128xf32>
    %118 = vector.shape_cast %117 : vector<1x8x128xf32> to vector<8x128xf32>
    %119 = vector.shape_cast %116 : vector<8x128xf32> to vector<1x8x128xf32>
    tpu.vector_store %arg3[%c1_18, %c0_19, %c0_20], %119 {strides = array<i32>} : memref<3x8x128xf32, #tpu.memory_space<vmem>>, vector<1x8x128xf32>,
    %120 = vector.broadcast %4 : f32 to vector<8x128xf32>
    %121 = arith.mulf %37, %120 : vector<8x128xf32>
    %122 = vector.broadcast %5 : f32 to vector<8x128xf32>
    %123 = arith.mulf %39, %122 : vector<8x128xf32>
    %124 = arith.addf %121, %123 : vector<8x128xf32>
    %125 = vector.broadcast %8 : f32 to vector<8x128xf32>
    %126 = arith.addf %124, %125 : vector<8x128xf32>
    %127 = vector.broadcast %21 : f32 to vector<8x128xf32>
    %128 = arith.mulf %37, %127 : vector<8x128xf32>
    %129 = vector.broadcast %22 : f32 to vector<8x128xf32>
    %130 = arith.mulf %39, %129 : vector<8x128xf32>
    %131 = arith.addf %128, %130 : vector<8x128xf32>
    %132 = vector.broadcast %33 : f32 to vector<8x128xf32>
    %133 = arith.addf %131, %132 : vector<8x128xf32>
    %134 = arith.mulf %133, %41 : vector<8x128xf32>
    %135 = arith.addf %126, %134 : vector<8x128xf32>
    %136 = vector.broadcast %23 : f32 to vector<8x128xf32>
    %137 = arith.mulf %37, %136 : vector<8x128xf32>
    %138 = vector.broadcast %24 : f32 to vector<8x128xf32>
    %139 = arith.mulf %39, %138 : vector<8x128xf32>
    %140 = arith.addf %137, %139 : vector<8x128xf32>
    %141 = vector.broadcast %34 : f32 to vector<8x128xf32>
    %142 = arith.addf %140, %141 : vector<8x128xf32>
    %143 = arith.mulf %142, %43 : vector<8x128xf32>
    %144 = arith.addf %135, %143 : vector<8x128xf32>
    %145 = vector.broadcast %25 : f32 to vector<8x128xf32>
    %146 = arith.mulf %37, %145 : vector<8x128xf32>
    %147 = vector.broadcast %26 : f32 to vector<8x128xf32>
    %148 = arith.mulf %39, %147 : vector<8x128xf32>
    %149 = arith.addf %146, %148 : vector<8x128xf32>
    %150 = vector.broadcast %35 : f32 to vector<8x128xf32>
    %151 = arith.addf %149, %150 : vector<8x128xf32>
    %152 = arith.mulf %151, %45 : vector<8x128xf32>
    %153 = arith.addf %144, %152 : vector<8x128xf32>
    %c2_21 = arith.constant 2 : index
    %c0_22 = arith.constant 0 : index
    %c0_23 = arith.constant 0 : index
    %154 = vector.load %arg3[%c2_21, %c0_22, %c0_23] : memref<3x8x128xf32, #tpu.memory_space<vmem>>, vector<1x8x128xf32>
    %155 = vector.shape_cast %154 : vector<1x8x128xf32> to vector<8x128xf32>
    %156 = vector.shape_cast %153 : vector<8x128xf32> to vector<1x8x128xf32>
    tpu.vector_store %arg3[%c2_21, %c0_22, %c0_23], %156 {strides = array<i32>} : memref<3x8x128xf32, #tpu.memory_space<vmem>>, vector<1x8x128xf32>,
    return
  }
  func.func @transform_0(%arg0: i32, %arg1: memref<36xf32, #tpu.memory_space<smem>>) -> (i32, i32, i32) {
    %c0_i32 = arith.constant 0 : i32
    %c0_i32_0 = arith.constant 0 : i32
    %c0_i32_1 = arith.constant 0 : i32
    return %c0_i32, %arg0, %c0_i32_0 : i32, i32, i32
  }
  func.func @transform_1(%arg0: i32, %arg1: memref<36xf32, #tpu.memory_space<smem>>) -> (i32, i32, i32) {
    %c0_i32 = arith.constant 0 : i32
    %c0_i32_0 = arith.constant 0 : i32
    %c0_i32_1 = arith.constant 0 : i32
    return %c0_i32, %arg0, %c0_i32_0 : i32, i32, i32
  }
}

</mosaic_0001>

<bundles_post_ra>
// kernel: mass_estimate_forward_feature_major.1
= control target key start
LH: loop header
LB: loop body
LE: loop exit
PB: predicated region body
PF: predicated region fallthrough
CT: control target
= control target key end

     0   :  { %s334_s0 = inlined_call_operand.vmem [shape: f32[36], index: 0, kind: input, shape index: {}]   ;;  %s335_s1 = inlined_call_operand.vmem [shape: f32[5,8,128], index: 1, kind: input, shape index: {}]   ;;  %s336_s2 = inlined_call_operand.vmem [shape: f32[3,8,128], index: 2, kind: output, shape index: {}]  }
   0x1   :  { %s7_s11 = sshll.u32 %s334_s0, 4  ;;  %s8_s11 = int_to_ptr.vmem [resolvable:$true] %s7_s11 }
   0x2   :  { %s213_s12 = scalar_lea.vmem %s8_s11, 16  ;;  %p218_p1 = scmp.lt.s32.totalorder %s8_s11, %s8_s11 }
   0x3   :  { %p214_p0 = scmp.ne.s32.totalorder %s8_s11, %s213_s12  ;;  %p219_p2 = scmp.lt.s32.totalorder %s213_s12, %s213_s12 }
   0x5   :  { %p220_p3 = por %p219_p2, %p218_p1 }
   0x7   :  { %p221_p4 = pnand %p220_p3, %p214_p0 }
   0x9   :  { %224 = shalt.err (!%p221_p4)  }
   0xa   :  { %s227_s13 = smov [#allocation3]  }
   0xb   :  { %10 = dma.vmem_to_smem %s8_s11, 16, %s227_s13, [#allocation2] }
   0xc   :  { %225 = dma.done.wait [#allocation2], 16 }
   0xd   :  { %226 = vsyncadd [#allocation2], 4294967280 }
   0xe   :  { %12 = sfence }
   0xf   :  { %s15_s14 = sld [smem:[#allocation3]]  ;;  %v251_v1 = vld [vmem:[%s335_s1] sm:$0xff]  ;;  %v256_v2 = vld [vmem:[%s335_s1 + $0x8] sm:$0xff]  ;;  %v275_v20 = vld [vmem:[%s335_s1 + $0x10] sm:$0xff] }
  0x10   :  { %s171_s15 = sld [smem:[#allocation3 + $0x1]]  ;;  %v281_v24 = vld [vmem:[%s335_s1 + $0x18] sm:$0xff]  ;;  %v287_v31 = vld [vmem:[%s335_s1 + $0x20] sm:$0xff] }
  0x11   :  { %s246_s16 = sld [smem:[#allocation3 + $0x6]] }
  0x12   :  { %s179_s17 = sld [smem:[#allocation3 + $0x9]] }
  0x13   :  { %s180_s18 = sld [smem:[#allocation3 + $0xa]] }
  0x14   :  { %s181_s0 = sld [smem:[#allocation3 + $0xb]] }
  0x15   :  { %s182_s19 = sld [smem:[#allocation3 + $0xc]]  ;;  %v60_v0 = vstv %s15_s14 }
  0x16   :  { %s183_s20 = sld [smem:[#allocation3 + $0xd]]  ;;  %v62_v3 = vstv %s171_s15  ;;  %v61_v4 = vmul.f32 %v60_v0, %v251_v1 }
  0x17   :  { %s184_s25 = sld [smem:[#allocation3 + $0xe]]  ;;  %v63_v5 = vmul.f32 %v256_v2, %v62_v3  ;;  %v65_v14 = vstv %s246_s16 }
  0x18   :  { %s197_s26 = sld [smem:[#allocation3 + $0x1b]]  ;;  %v67_v6 = vstv %s179_s17 }
  0x19   :  { %s198_s27 = sld [smem:[#allocation3 + $0x1c]]  ;;  %v68_v7 = vmul.f32 %v67_v6, %v251_v1  ;;  %v69_v8 = vstv %s180_s18  ;;  %v64_v11 = vadd.f32 %v63_v5, %v61_v4 }
  0x1a   :  { %s261_s28 = sld [smem:[#allocation3 + $0x1d]]  ;;  %v70_v9 = vmul.f32 %v256_v2, %v69_v8  ;;  %v76_v10 = vstv %s181_s0 }
  0x1b   :  { %v77_v12 = vmul.f32 %v76_v10, %v251_v1  ;;  %v78_v13 = vstv %s182_s19  ;;  %s265_s29 = sld [smem:[#allocation3 + $0x2]]  ;;  %v66_v25 = vadd.f32 %v65_v14, %v64_v11 }
  0x1c   :  { %v71_v15 = vadd.f32 %v70_v9, %v68_v7  ;;  %v79_v16 = vmul.f32 %v256_v2, %v78_v13  ;;  %v85_v17 = vstv %s183_s20  ;;  %s173_s30 = sld [smem:[#allocation3 + $0x3]] }
  0x1d   :  { %v86_v18 = vmul.f32 %v85_v17, %v251_v1  ;;  %v87_v19 = vstv %s184_s25  ;;  %s270_s3 = sld [smem:[#allocation3 + $0x7]] }
  0x1e   :  { %v72_v21 = vstv %s197_s26  ;;  %v80_v22 = vadd.f32 %v79_v16, %v77_v12  ;;  %v88_v23 = vmul.f32 %v256_v2, %v87_v19  ;;  %s185_s6 = sld [smem:[#allocation3 + $0xf]] }
  0x1f   :  { %v73_v26 = vadd.f32 %v72_v21, %v71_v15  ;;  %v81_v27 = vstv %s198_s27  ;;  %s186_s9 = sld [smem:[#allocation3 + $0x10]] }
  0x20   :  { %v82_v28 = vadd.f32 %v81_v27, %v80_v22  ;;  %v89_v29 = vadd.f32 %v88_v23, %v86_v18  ;;  %v90_v30 = vstv %s261_s28  ;;  %s187_s10 = sld [smem:[#allocation3 + $0x11]] }
  0x21   :  { %v74_v32 = vmul.f32 %v275_v20, %v73_v26  ;;  %s188_s13 = sld [smem:[#allocation3 + $0x12]]  ;;  %v95_v33 = vstv %s265_s29 }
  0x22   :  { %v83_v34 = vmul.f32 %v281_v24, %v82_v28  ;;  %v91_v35 = vadd.f32 %v90_v30, %v89_v29  ;;  %s189_s14 = sld [smem:[#allocation3 + $0x13]]  ;;  %v97_v36 = vstv %s173_s30  ;;  %v96_v38 = vmul.f32 %v95_v33, %v251_v1 }
  0x23   :  { %v75_v37 = vadd.f32 %v74_v32, %v66_v25  ;;  %s190_s15 = sld [smem:[#allocation3 + $0x14]]  ;;  %v98_v39 = vmul.f32 %v256_v2, %v97_v36  ;;  %v100_v51 = vstv %s270_s3 }
  0x24   :  { %v92_v40 = vmul.f32 %v287_v31, %v91_v35  ;;  %s200_s1 = sld [smem:[#allocation3 + $0x1e]]  ;;  %v102_v41 = vstv %s185_s6 }
  0x25   :  { %v84_v42 = vadd.f32 %v83_v34, %v75_v37  ;;  %s201_s16 = sld [smem:[#allocation3 + $0x1f]]  ;;  %v103_v43 = vmul.f32 %v102_v41, %v251_v1  ;;  %v104_v44 = vstv %s186_s9  ;;  %v99_v48 = vadd.f32 %v98_v39, %v96_v38 }
  0x26   :  { %s296_s17 = sld [smem:[#allocation3 + $0x20]]  ;;  %v105_v45 = vmul.f32 %v256_v2, %v104_v44  ;;  %v111_v46 = vstv %s187_s10 }
  0x27   :  { %v93_v47 = vadd.f32 %v92_v40, %v84_v42  ;;  %v112_v49 = vmul.f32 %v111_v46, %v251_v1  ;;  %v113_v50 = vstv %s188_s13  ;;  %s300_s18 = sld [smem:[#allocation3 + $0x4]]  ;;  %v101_v60 = vadd.f32 %v100_v51, %v99_v48 }
  0x28   :  { %v106_v52 = vadd.f32 %v105_v45, %v103_v43  ;;  %v114_v53 = vmul.f32 %v256_v2, %v113_v50  ;;  %v120_v54 = vstv %s189_s14  ;;  %s175_s0 = sld [smem:[#allocation3 + $0x5]] }
  0x29   :  { %94 = vst [vmem:[%s336_s2] sm:$0xff] %v93_v47  ;;  %v121_v55 = vmul.f32 %v120_v54, %v251_v1  ;;  %v122_v56 = vstv %s190_s15  ;;  %s308_s21 = sld [smem:[#allocation3 + $0x8]] }
  0x2a   :  { %v107_v57 = vstv %s200_s1  ;;  %v115_v58 = vadd.f32 %v114_v53, %v112_v49  ;;  %v123_v59 = vmul.f32 %v256_v2, %v122_v56  ;;  %s191_s22 = sld [smem:[#allocation3 + $0x15]] }
  0x2b   :  { %v108_v61 = vadd.f32 %v107_v57, %v106_v52  ;;  %v116_v62 = vstv %s201_s16  ;;  %s192_s23 = sld [smem:[#allocation3 + $0x16]] }
  0x2c   :  { %v117_v63 = vadd.f32 %v116_v62, %v115_v58  ;;  %v124_v0 = vadd.f32 %v123_v59, %v121_v55  ;;  %v125_v3 = vstv %s296_s17  ;;  %s193_s24 = sld [smem:[#allocation3 + $0x17]] }
  0x2d   :  { %v109_v4 = vmul.f32 %v275_v20, %v108_v61  ;;  %s194_s25 = sld [smem:[#allocation3 + $0x18]]  ;;  %v131_v5 = vstv %s300_s18 }
  0x2e   :  { %v118_v6 = vmul.f32 %v281_v24, %v117_v63  ;;  %v126_v7 = vadd.f32 %v125_v3, %v124_v0  ;;  %s195_s26 = sld [smem:[#allocation3 + $0x19]]  ;;  %v133_v8 = vstv %s175_s0  ;;  %v132_v10 = vmul.f32 %v131_v5, %v251_v1 }
  0x2f   :  { %v110_v9 = vadd.f32 %v109_v4, %v101_v60  ;;  %s196_s27 = sld [smem:[#allocation3 + $0x1a]]  ;;  %v134_v11 = vmul.f32 %v256_v2, %v133_v8  ;;  %v136_v25 = vstv %s308_s21 }
  0x30   :  { %v127_v12 = vmul.f32 %v287_v31, %v126_v7  ;;  %s203_s28 = sld [smem:[#allocation3 + $0x21]]  ;;  %v138_v13 = vstv %s191_s22 }
  0x31   :  { %v119_v14 = vadd.f32 %v118_v6, %v110_v9  ;;  %s204_s29 = sld [smem:[#allocation3 + $0x22]]  ;;  %v139_v15 = vmul.f32 %v138_v13, %v251_v1  ;;  %v140_v16 = vstv %s192_s23  ;;  %v135_v21 = vadd.f32 %v134_v11, %v132_v10 }
  0x32   :  { %s205_s30 = sld [smem:[#allocation3 + $0x23]]  ;;  %v141_v17 = vmul.f32 %v256_v2, %v140_v16  ;;  %v147_v18 = vstv %s193_s24 }
  0x33   :  { %v128_v19 = vadd.f32 %v127_v12, %v119_v14  ;;  %v148_v22 = vmul.f32 %v147_v18, %v251_v1  ;;  %v149_v23 = vstv %s194_s25  ;;  %v137_v35 = vadd.f32 %v136_v25, %v135_v21 }
  0x34   :  { %v142_v26 = vadd.f32 %v141_v17, %v139_v15  ;;  %v150_v27 = vmul.f32 %v256_v2, %v149_v23  ;;  %v156_v28 = vstv %s195_s26 }
  0x35   :  { %210 = vst [vmem:[%s336_s2 + $0x8] sm:$0xff] %v128_v19  ;;  %v157_v29 = vmul.f32 %v156_v28, %v251_v1  ;;  %v158_v30 = vstv %s196_s27 }
  0x36   :  { %v143_v32 = vstv %s203_s28  ;;  %v151_v33 = vadd.f32 %v150_v27, %v148_v22  ;;  %v159_v34 = vmul.f32 %v256_v2, %v158_v30 }
  0x37   :  { %v144_v36 = vadd.f32 %v143_v32, %v142_v26  ;;  %v152_v37 = vstv %s204_s29 }
  0x38   :  { %v153_v38 = vadd.f32 %v152_v37, %v151_v33  ;;  %v160_v39 = vadd.f32 %v159_v34, %v157_v29  ;;  %v161_v40 = vstv %s205_s30 }
  0x39   :  { %v145_v41 = vmul.f32 %v275_v20, %v144_v36 }
  0x3a   :  { %v154_v42 = vmul.f32 %v281_v24, %v153_v38  ;;  %v162_v43 = vadd.f32 %v161_v40, %v160_v39 }
  0x3b   :  { %v146_v44 = vadd.f32 %v145_v41, %v137_v35 }
  0x3c   :  { %v163_v45 = vmul.f32 %v287_v31, %v162_v43 }
  0x3d   :  { %v155_v1 = vadd.f32 %v154_v42, %v146_v44 }
  0x3f   :  { %v164_v46 = vadd.f32 %v163_v45, %v155_v1 }
  0x41   :  { %211 = vst [vmem:[%s336_s2 + $0x10] sm:$0xff] %v164_v46 }

</bundles_post_ra>
